<compile_context>
chip_gen: v7x
topology: tpu7x:2x2x1
jax: 0.10.0
libtpu: 0.0.40
codegen_flags: <defaults>
</compile_context>

<pallas_src>
import jax
import jax.numpy as jnp
from jax.experimental import pallas as pl
from jax.experimental.pallas import tpu as pltpu


def _round_up(x, m):
    return ((x + m - 1) // m) * m


def _pick_tile(padded, cap):
    """Largest multiple of 128 that is <= cap and divides `padded` (a multiple of 128)."""
    t = min(cap, padded)
    while padded % t != 0:
        t -= 128
    return max(t, 128)


def _gather_mm_kernel(x1g_ref, x2_ref, o_ref):
    """Grid step = (I-tile i, N-tile j, K-tile k).  K is innermost, so o_ref
    (f32, (tm, tn)) stays resident across the K axis and is used directly as
    the accumulator (P3 pattern, no scratch)."""
    @pl.when(pl.program_id(2) == 0)
    def _():
        o_ref[...] = jnp.zeros_like(o_ref)

    o_ref[...] += jnp.dot(
        x1g_ref[...], x2_ref[...], preferred_element_type=jnp.float32
    )


def mm_then_index(x1, x2, inp1, *, use_pallas=None, operand_dtype=None):
    """Returns (x1 @ x2)[inp1, :], computed as x1[inp1, :] @ x2.

    use_pallas:    None -> auto (small-shape XLA fast path); True/False to force.
    operand_dtype: e.g. jnp.bfloat16 on v6e/v7x to halve RHS traffic and use the
                   bf16-native MXU; accumulation stays f32.
    """
    M, K = x1.shape
    K2, N = x2.shape
    assert K == K2
    I = inp1.shape[0]

    # Safety guard: TPU VMEM/gathers have no runtime OOB check, so clamp indices.
    idx = jnp.clip(inp1.astype(jnp.int32), 0, M - 1)

    if use_pallas is None:
        # For toy shapes the (8,128) padding + per-step grid overhead dwarfs the
        # math; plain XLA is strictly better there.
        use_pallas = (K >= 128) or (N >= 128) or (I >= 8)
    if not use_pallas:
        return (x1 @ x2)[idx, :]

    # Gather only the needed rows up front (I rows of HBM traffic).  This makes
    # the LHS sublane-dense and collapses the per-row grid axis, so x2 is read
    # from HBM exactly once.
    x1g = jnp.take(x1, idx, axis=0)  # (I, K)

    op_dtype = jnp.dtype(operand_dtype) if operand_dtype is not None else x1.dtype

    # Tile / padding selection (pad only to multiples of 128; tiles divide the
    # padded extents exactly).
    tm = min(_round_up(I, 8), 256)      # cap fine for v5e (128-wide MXU) too
    Ip = _round_up(I, tm)
    Kp = _round_up(K, 128)
    Np = _round_up(N, 128)
    tk = _pick_tile(Kp, 512)
    tn = _pick_tile(Np, 512)            # lane-dense output slab

    x1p = jnp.pad(x1g.astype(op_dtype), ((0, Ip - I), (0, Kp - K)))
    x2p = jnp.pad(x2.astype(op_dtype), ((0, Kp - K), (0, Np - N)))

    grid = (Ip // tm, Np // tn, Kp // tk)

    out = pl.pallas_call(
        _gather_mm_kernel,
        out_shape=jax.ShapeDtypeStruct((Ip, Np), jnp.float32),
        grid_spec=pltpu.PrefetchScalarGridSpec(
            num_scalar_prefetch=0,
            grid=grid,
            in_specs=[
                pl.BlockSpec((tm, tk), lambda i, j, k: (i, k)),
                pl.BlockSpec((tk, tn), lambda i, j, k: (k, j)),
            ],
            out_specs=pl.BlockSpec((tm, tn), lambda i, j, k: (i, j)),
        ),
        compiler_params=pltpu.CompilerParams(
            # I / N axes are independent (megacore-shardable); K is the
            # accumulation (revisit) axis and must stay innermost.
            dimension_semantics=("parallel", "parallel", "arbitrary"),
            # Worst-case double-buffered footprint (tm=256, tk=tn=512, f32) is
            # ~5 MiB, comfortably inside v7x's 64 MiB as well as v5e/v6e.
            vmem_limit_bytes=32 * 1024 * 1024,
        ),
    )(x1p, x2p)

    return out[:I, :N].astype(jnp.float32)


if __name__ == "__main__":
    key = jax.random.PRNGKey(0)
    k1, k2, k3, k4, k5 = jax.random.split(key, 5)

    # --- Shapes implied by the module: x1 (1, 25), x2 (25, 7), inp1 (3,) ---
    x1 = jax.random.normal(k1, (1, 25), dtype=jnp.float32)
    x2 = jax.random.normal(k2, (25, 7), dtype=jnp.float32)
    inp1 = jnp.zeros((3,), dtype=jnp.int32)  # only valid row index is 0 (M == 1)
    ref = (x1 @ x2)[inp1, :]

    # 1) Default path: small-shape XLA fast path (toy shapes skip the kernel).
    out_fast = mm_then_index(x1, x2, inp1)
    jax.block_until_ready(out_fast)
    assert out_fast.shape == ref.shape
    assert jnp.allclose(out_fast, ref, atol=1e-5, rtol=1e-5)

    # 2) Force the Pallas kernel on the toy shapes (exercises the padding path).
    out_k = mm_then_index(x1, x2, inp1, use_pallas=True)
    jax.block_until_ready(out_k)
    assert out_k.shape == ref.shape
    assert jnp.allclose(out_k, ref, atol=1e-4, rtol=1e-4)

    # 3) Larger shapes exercising the gather, multi-tile K accumulation and
    #    padded N tiling inside the kernel.
    x1b = jax.random.normal(k3, (37, 700), dtype=jnp.float32)
    x2b = jax.random.normal(k4, (700, 300), dtype=jnp.float32)
    idxb = jax.random.randint(k5, (19,), 0, 37, dtype=jnp.int32)
    outb = mm_then_index(x1b, x2b, idxb)
    jax.block_until_ready(outb)
    refb = (x1b @ x2b)[idxb, :]
    assert outb.shape == refb.shape
    # Loose tolerance: MXU matmul precision may differ slightly from XLA's dot.
    assert jnp.allclose(outb, refb, atol=1e-2, rtol=1e-2)

    print("KERNEL_OK")
</pallas_src>

<mosaic_0001>
module attributes {stable_mosaic.version = 11 : i64} {
  func.func @_gather_mm_kernel(%arg0: i32, %arg1: i32, %arg2: i32, %arg3: memref<8x128xf32, #tpu.memory_space<vmem>>, %arg4: memref<128x128xf32, #tpu.memory_space<vmem>>, %arg5: memref<8x128xf32, #tpu.memory_space<vmem>>) attributes {dimension_semantics = [#tpu.dimension_semantics<parallel>, #tpu.dimension_semantics<parallel>, #tpu.dimension_semantics<arbitrary>], iteration_bounds = array<i64: 1, 1, 1>, scalar_prefetch = 0 : i64, scratch_operands = 0 : i64, tpu.core_type = #tpu.core_type<tc>, window_params = [{transform_indices = @transform_0, window_bounds = array<i64: 8, 128>}, {transform_indices = @transform_1, window_bounds = array<i64: 128, 128>}, {transform_indices = @transform_2, window_bounds = array<i64: 8, 128>}]} {
    %c0_i32 = arith.constant 0 : i32
    %0 = arith.cmpi eq, %arg2, %c0_i32 : i32
    %1 = arith.extui %0 : i1 to i32
    %c0_i32_0 = arith.constant 0 : i32
    %2 = arith.cmpi ne, %1, %c0_i32_0 : i32
    scf.if %2 {
      %cst_8 = arith.constant 0.000000e+00 : f32
      %9 = vector.broadcast %cst_8 : f32 to vector<8x128xf32>
      %c0_9 = arith.constant 0 : index
      %c0_10 = arith.constant 0 : index
      %10 = vector.load %arg5[%c0_9, %c0_10] : memref<8x128xf32, #tpu.memory_space<vmem>>, vector<8x128xf32>
      tpu.vector_store %arg5[%c0_9, %c0_10], %9 {strides = array<i32>} : memref<8x128xf32, #tpu.memory_space<vmem>>, vector<8x128xf32>,
    } else {
    }
    %c0 = arith.constant 0 : index
    %c0_1 = arith.constant 0 : index
    %3 = vector.load %arg5[%c0, %c0_1] : memref<8x128xf32, #tpu.memory_space<vmem>>, vector<8x128xf32>
    %c0_2 = arith.constant 0 : index
    %c0_3 = arith.constant 0 : index
    %4 = vector.load %arg3[%c0_2, %c0_3] : memref<8x128xf32, #tpu.memory_space<vmem>>, vector<8x128xf32>
    %c0_4 = arith.constant 0 : index
    %c0_5 = arith.constant 0 : index
    %5 = vector.load %arg4[%c0_4, %c0_5] : memref<128x128xf32, #tpu.memory_space<vmem>>, vector<128x128xf32>
    %cst = arith.constant dense<0.000000e+00> : vector<8x128xf32>
    %6 = tpu.matmul %4, %5, %cst {dimension_numbers = #tpu.dot_dimension_numbers<[1], [0], [0], [1], [0, 0, 1, 1], [], []>} : vector<8x128xf32>, vector<128x128xf32>, vector<8x128xf32> -> vector<8x128xf32>
    %7 = arith.addf %3, %6 : vector<8x128xf32>
    %c0_6 = arith.constant 0 : index
    %c0_7 = arith.constant 0 : index
    %8 = vector.load %arg5[%c0_6, %c0_7] : memref<8x128xf32, #tpu.memory_space<vmem>>, vector<8x128xf32>
    tpu.vector_store %arg5[%c0_6, %c0_7], %7 {strides = array<i32>} : memref<8x128xf32, #tpu.memory_space<vmem>>, vector<8x128xf32>,
    return
  }
  func.func @transform_0(%arg0: i32, %arg1: i32, %arg2: i32) -> (i32, i32) {
    %c0_i32 = arith.constant 0 : i32
    return %arg0, %arg2 : i32, i32
  }
  func.func @transform_1(%arg0: i32, %arg1: i32, %arg2: i32) -> (i32, i32) {
    %c0_i32 = arith.constant 0 : i32
    return %arg2, %arg1 : i32, i32
  }
  func.func @transform_2(%arg0: i32, %arg1: i32, %arg2: i32) -> (i32, i32) {
    %c0_i32 = arith.constant 0 : i32
    return %arg0, %arg1 : i32, i32
  }
}

</mosaic_0001>

<bundles_post_ra>
// kernel: tpu_custom_call.1
= control target key start
LH: loop header
LB: loop body
LE: loop exit
PB: predicated region body
PF: predicated region fallthrough
CT: control target
= control target key end

     0   :  { %7 = vsyncpa [#allocation3], 0  ;;  %s371_s0 = inlined_call_operand.hbm [shape: f32[8,128], index: 0, kind: input, shape index: {}]   ;;  %s372_s1 = inlined_call_operand.hbm [shape: f32[128,128], index: 1, kind: input, shape index: {}]   ;;  %s373_s2 = inlined_call_operand.hbm [shape: f32[8,128], index: 2, kind: output, shape index: {}]  }
   0x1   :  { %8 = vsyncpa [#allocation6], 0 }
   0x2   :  { %9 = vsyncpa [#allocation4], 0  ;;  %s305_s9 = smov [#allocation2]   ;;  %s306_s11 = smov [#allocation5]  }
   0x3   :  { %s16_s10 = sshll.u32 %s305_s9, 4  ;;  %s25_s12 = sshll.u32 %s306_s11, 4  ;;  %s17_s10 = int_to_ptr.vmem [resolvable:$true] %s16_s10  ;;  %s328_s12 = int_to_ptr.vmem [resolvable:$true] %s25_s12 }
   0x4   :  { %s233_s15 = scalar_lea.hbm %s371_s0, 128 }
   0x5   :  { %p234_p0 = scmp.ne.s32.totalorder %s371_s0, %s233_s15  ;;  %p237_p1 = scmp.lt.u32.totalorder %s233_s15, %s371_s0 }
   0x7   :  { %p239_p2 = pnand %p237_p1, %p234_p0 }
   0x9   :  { %242 = shalt.err (!%p239_p2)
}
   0xa   :  { %s243_s20 = scalar_lea.vmem %s17_s10, 128  ;;  %p248_p4 = scmp.lt.s32.totalorder %s17_s10, %s17_s10 }
   0xb   :  { %p244_p3 = scmp.ne.s32.totalorder %s17_s10, %s243_s20  ;;  %p249_p5 = scmp.lt.s32.totalorder %s243_s20, %s243_s20 }
   0xd   :  { %p250_p6 = por %p249_p5, %p248_p4 }
   0xf   :  { %p251_p7 = pnand %p250_p6, %p244_p3 }
  0x11   :  { %254 = shalt.err (!%p251_p7)
}
  0x12   :  { %19 = dma.hbm_to_vmem [thread:$0]  %s371_s0, 128, %s17_s10, [#allocation3]  }
  0x13   :  { %s255_s25 = scalar_lea.hbm %s372_s1, 2048 }
  0x14   :  { %p256_p8 = scmp.ne.s32.totalorder %s372_s1, %s255_s25  ;;  %p259_p9 = scmp.lt.u32.totalorder %s255_s25, %s372_s1 }
  0x16   :  { %p261_p10 = pnand %p259_p9, %p256_p8 }
  0x18   :  { %264 = shalt.err (!%p261_p10)
}
  0x19   :  { %s265_s30 = scalar_lea.vmem %s328_s12, 2048  ;;  %p270_p12 = scmp.lt.s32.totalorder %s328_s12, %s328_s12 }
  0x1a   :  { %p266_p11 = scmp.ne.s32.totalorder %s328_s12, %s265_s30  ;;  %p271_p13 = scmp.lt.s32.totalorder %s265_s30, %s265_s30 }
  0x1c   :  { %p272_p0 = por %p271_p13, %p270_p12 }
  0x1e   :  { %p273_p1 = pnand %p272_p0, %p266_p11 }
  0x20   :  { %276 = shalt.err (!%p273_p1)
}
  0x21   :  { %s307_s0 = smov 128   ;;  %s308_s3 = smov 8  }
  0x22   :  { %31 = dma.hbm_to_vmem [thread:$0]  %s372_s1, 2048, %s328_s12, [#allocation6], %s307_s0, %s307_s0, %s308_s3  }
  0x23   :  { %299 = dma.done.wait [#allocation3], 128  }
  0x24   :  { %300 = vsyncadd [#allocation3], 4294967168 }
  0x25   :  { %301 = dma.done.wait [#allocation6], 2048  }
  0x26   :  { %302 = vsyncadd [#allocation6], 4294965248  ;;  %v309_v0 = vmov 0.0|0.0   ;;  %vm310_vm0 = vmmov 0   ;;  %v311_v1 = vmov 0.0   ;;  %v45_v2 = vld [vmem:[#allocation5] sm:$0xff] }
  0x27   :  { %201 = vmatprep.subr.bf16.mxu0 %v309_v0  ;;  %198 = vmatprep.mubr.msk.f32.mxu0 %vm310_vm0, %v311_v1  ;;  %v46_v3 = vld [vmem:[#allocation5 + $0x8] sm:$0xff]  ;;  %v47_v4 = vld [vmem:[#allocation5 + $0x10] sm:$0xff]  ;;  %v48_v6 = vld [vmem:[#allocation5 + $0x18] sm:$0xff]  ;;  %s312_s1 = smov [#allocation7]  }
  0x28   :  { %v202_v5 = vpack.c.bf16 %v46_v3, %v45_v2  ;;  %v205_v7 = vpack.c.bf16 %v48_v6, %v47_v4  ;;  %v49_v8 = vld [vmem:[#allocation5 + $0x20] sm:$0xff]  ;;  %v50_v9 = vld [vmem:[#allocation5 + $0x28] sm:$0xff]  ;;  %v51_v11 = vld [vmem:[#allocation5 + $0x30] sm:$0xff]  ;;  %s139_s6 = sshll.u32 %s312_s1, 4  ;;  %s140_s6 = int_to_ptr.vmem [resolvable:$true] %s139_s6 }
  0x29   :  { %v208_v10 = vpack.c.bf16 %v50_v9, %v49_v8  ;;  %v52_v12 = vld [vmem:[#allocation5 + $0x38] sm:$0xff]  ;;  %v53_v14 = vld [vmem:[#allocation5 + $0x40] sm:$0xff]  ;;  %v54_v15 = vld [vmem:[#allocation5 + $0x48] sm:$0xff]  ;;  %s277_s7 = scalar_lea.vmem %s140_s6, 128  ;;  %p282_p3 = scmp.lt.s32.totalorder %s140_s6, %s140_s6 }
  0x2a   :  { %203 = vmatpush3.bf16.msra.mxu0 %v202_v5  ;;  %v211_v13 = vpack.c.bf16 %v52_v12, %v51_v11  ;;  %v214_v16 = vpack.c.bf16 %v54_v15, %v53_v14  ;;  %v55_v17 = vld [vmem:[#allocation5 + $0x50] sm:$0xff]  ;;  %v56_v18 = vld [vmem:[#allocation5 + $0x58] sm:$0xff]  ;;  %v57_v20 = vld [vmem:[#allocation5 + $0x60] sm:$0xff]  ;;  %p278_p2 = scmp.ne.s32.totalorder %s140_s6, %s277_s7  ;;  %p283_p4 = scmp.lt.s32.totalorder %s277_s7, %s277_s7 }
  0x2b   :  { %204 = vmatprep.subr.bf16.mxu0 %v309_v0  ;;  %v217_v19 = vpack.c.bf16 %v56_v18, %v55_v17  ;;  %v58_v21 = vld [vmem:[#allocation5 + $0x68] sm:$0xff]  ;;  %v59_v23 = vld [vmem:[#allocation5 + $0x70] sm:$0xff]  ;;  %v60_v24 = vld [vmem:[#allocation5 + $0x78] sm:$0xff] }
  0x2c   :  { %v220_v22 = vpack.c.bf16 %v58_v21, %v57_v20  ;;  %v223_v25 = vpack.c.bf16 %v60_v24, %v59_v23  ;;  %v44_v26 = vld [vmem:[#allocation2] sm:$0xff]  ;;  %p284_p5 = por %p283_p4, %p282_p3 }
  0x2e   :  { %206 = vmatpush3.bf16.msra.mxu0 %v205_v7  ;;  %p285_p6 = pnand %p284_p5, %p278_p2 }
  0x2f   :  { %207 = vmatprep.subr.bf16.mxu0 %v309_v0 }
  0x32   :  { %209 = vmatpush3.bf16.msra.mxu0 %v208_v10 }
  0x33   :  { %210 = vmatprep.subr.bf16.mxu0 %v309_v0 }
  0x36   :  { %212 = vmatpush3.bf16.msra.mxu0 %v211_v13 }
  0x37   :  { %213 = vmatprep.subr.bf16.mxu0 %v309_v0 }
  0x3a   :  { %215 = vmatpush3.bf16.msra.mxu0 %v214_v16 }
  0x3b   :  { %216 = vmatprep.subr.bf16.mxu0 %v309_v0 }
  0x3e   :  { %218 = vmatpush3.bf16.msra.mxu0 %v217_v19 }
  0x3f   :  { %219 = vmatprep.subr.bf16.mxu0 %v309_v0 }
  0x42   :  { %221 = vmatpush3.bf16.msra.mxu0 %v220_v22 }
  0x43   :  { %222 = vmatprep.subr.bf16.mxu0 %v309_v0 }
  0x46   :  { %224 = vmatpush3.bf16.msra.mxu0 %v223_v25 }
  0x49   :  { %199 = vmatmul.mubr.f32.vlgmr.msra.gmra.mrb[0].mxu0 %v44_v26 }
 0x11c   :  { %v127_v27 = vpop.f32.mrb[0].mxu0 }
 0x11d   :  { %v200_v28 = vpop.f32.mrb[1].mxu0  ;;  %132 = vst [vmem:[#allocation7] sm:$0xff] %v127_v27 }
 0x11e   :  { %288 = shalt.err (!%p285_p6)
}
 0x11f   :  { %s289_s10 = scalar_lea.hbm %s373_s2, 128 }
 0x120   :  { %p290_p7 = scmp.ne.s32.totalorder %s373_s2, %s289_s10  ;;  %p293_p8 = scmp.lt.u32.totalorder %s289_s10, %s373_s2 }
 0x122   :  { %p295_p9 = pnand %p293_p8, %p290_p7 }
 0x124   :  { %298 = shalt.err (!%p295_p9)
}
 0x125   :  { %142 = dma.vmem_to_hbm [thread:$0]  %s140_s6, 128, %s373_s2, [#allocation4]  }
 0x126   :  { %303 = dma.done.wait [#allocation4], 128  }
 0x127   :  { %304 = vsyncadd [#allocation4], 4294967168 }
 0x128   :  { %146 = vsyncpa [#allocation3], 1 }
 0x129   :  { %147 = vsyncpa [#allocation6], 1 }
 0x12a   :  { %148 = vsyncpa [#allocation4], 1 }

</bundles_post_ra>
